<compile_context>
chip_gen: v7x
topology: tpu7x:2x2x1
jax: 0.10.0
libtpu: 0.0.40
codegen_flags: <defaults>
</compile_context>

<pallas_src>
import functools

import jax
import jax.numpy as jnp
from jax.experimental import pallas as pl
from jax.experimental.pallas import tpu as pltpu


def _round_up(x, m):
    return ((x + m - 1) // m) * m


def _mlp_kernel(x_ref, w1_ref, b1_ref, w2_ref, b2_ref, w3_ref, b3_ref, o_ref):
    """Transposed 3-layer MLP; every tensor is (features, time-tile)."""
    x = x_ref[...]                                                    # (din, tn)

    h = jnp.dot(w1_ref[...], x, preferred_element_type=jnp.float32) + b1_ref[...]
    h = jnp.where(h > 0, h, 0.01 * h)                                 # LeakyReLU

    h = jnp.dot(w2_ref[...], h, preferred_element_type=jnp.float32) + b2_ref[...]
    h = jnp.where(h > 0, h, 0.01 * h)                                 # LeakyReLU

    o = jnp.dot(w3_ref[...], h, preferred_element_type=jnp.float32) + b3_ref[...]
    o_ref[...] = o.astype(o_ref.dtype)                                # (c, tn)


@functools.partial(jax.jit, static_argnames=("tile_t",))
def ts_deep_fc_decoder(code_x, code_t, params, *, tile_t=1024):
    """Pallas implementation of TSDeepFCDecoder.forward.

    code_x : (B, T, Dim)  float32
    code_t : (B, T, 3)    float32
    returns: (B, nChannels, T)  float32
    """
    w1, b1, w2, b2, w3, b3 = params
    B, T, _ = code_x.shape
    din = w1.shape[0]                      # Dim + 3
    c = w3.shape[1]                        # nChannels

    # Fused wrapper prepass: concat features, move them to the sublane axis so
    # time is the lane axis, and pad T to a multiple of the lane tile.
    code_T = jnp.swapaxes(
        jnp.concatenate((code_x, code_t), axis=2).astype(jnp.float32), 1, 2
    )                                                                 # (B, din, T)

    tn = min(_round_up(max(tile_t, 128), 128), _round_up(T, 128))
    Tp = _round_up(T, tn)
    if Tp != T:
        code_T = jnp.pad(code_T, ((0, 0), (0, 0), (0, Tp - T)))

    # Weights in (out, in) orientation so the kernel computes W @ X; biases as
    # column vectors so they broadcast across lanes.
    w1T, w2T, w3T = w1.T, w2.T, w3.T
    b1c, b2c, b3c = b1.reshape(-1, 1), b2.reshape(-1, 1), b3.reshape(-1, 1)

    out = pl.pallas_call(
        _mlp_kernel,
        out_shape=jax.ShapeDtypeStruct((B, c, Tp), jnp.float32),
        grid_spec=pltpu.PrefetchScalarGridSpec(
            num_scalar_prefetch=0,
            grid=(B, Tp // tn),
            in_specs=[
                pl.BlockSpec((None, din, tn), lambda b, j: (b, 0, j)),  # activations
                pl.BlockSpec((din, din), lambda b, j: (0, 0)),          # w1.T (resident)
                pl.BlockSpec((din, 1), lambda b, j: (0, 0)),            # b1
                pl.BlockSpec((din, din), lambda b, j: (0, 0)),          # w2.T
                pl.BlockSpec((din, 1), lambda b, j: (0, 0)),            # b2
                pl.BlockSpec((c, din), lambda b, j: (0, 0)),            # w3.T
                pl.BlockSpec((c, 1), lambda b, j: (0, 0)),              # b3
            ],
            out_specs=pl.BlockSpec((None, c, tn), lambda b, j: (b, 0, j)),
        ),
        compiler_params=pltpu.CompilerParams(
            dimension_semantics=("parallel", "parallel")),
    )(code_T, w1T, b1c, w2T, b2c, w3T, b3c)

    return out[:, :, :T] if Tp != T else out


def init_params(key, dim, n_channels):
    """Deterministic init mimicking nn.Linear default (U[-1/sqrt(fan_in), +])."""
    din = dim + 3

    def linear(key, fan_in, fan_out):
        k1, k2 = jax.random.split(key)
        bound = 1.0 / jnp.sqrt(fan_in)
        # stored as (in, out) so the reference does x @ W (PyTorch stores (out, in))
        w = jax.random.uniform(k1, (fan_in, fan_out), jnp.float32, -bound, bound)
        b = jax.random.uniform(k2, (fan_out,), jnp.float32, -bound, bound)
        return w, b

    k1, k2, k3 = jax.random.split(key, 3)
    w1, b1 = linear(k1, din, din)
    w2, b2 = linear(k2, din, din)
    w3, b3 = linear(k3, din, n_channels)
    return (w1, b1, w2, b2, w3, b3)


def _reference(code_x, code_t, params):
    """Pure-JAX reference for correctness check."""
    w1, b1, w2, b2, w3, b3 = params
    code = jnp.concatenate((code_x, code_t), axis=2)
    h = code @ w1 + b1
    h = jnp.where(h > 0, h, 0.01 * h)
    h = h @ w2 + b2
    h = jnp.where(h > 0, h, 0.01 * h)
    o = h @ w3 + b3
    return jnp.transpose(o, (0, 2, 1))


if __name__ == "__main__":
    Dim, nChannels, B = 5, 4, 2

    key = jax.random.PRNGKey(0)
    kx, kt, kp = jax.random.split(key, 3)
    params = init_params(kp, Dim, nChannels)

    # Two small configs: a lane-aligned T (no padding path) and a ragged T
    # (padded path), both consistent with the module's (B, T, Dim)/(B, T, 3).
    for T in (256, 16):
        kxx, ktt = jax.random.split(jax.random.fold_in(kx, T))
        code_x = jax.random.normal(kxx, (B, T, Dim), jnp.float32)
        code_t = jax.random.normal(ktt, (B, T, 3), jnp.float32)

        out = ts_deep_fc_decoder(code_x, code_t, params)
        out = jax.block_until_ready(out)

        ref = _reference(code_x, code_t, params)
        assert out.shape == (B, nChannels, T), out.shape
        assert jnp.allclose(out, ref, atol=1e-5, rtol=1e-5), "mismatch vs reference"

    print("KERNEL_OK")
</pallas_src>

<mosaic_0001>
module attributes {stable_mosaic.version = 11 : i64} {
  func.func @_mlp_kernel(%arg0: i32, %arg1: i32, %arg2: memref<1x8x256xf32, #tpu.memory_space<vmem>>, %arg3: memref<8x8xf32, #tpu.memory_space<vmem>>, %arg4: memref<8x1xf32, #tpu.memory_space<vmem>>, %arg5: memref<8x8xf32, #tpu.memory_space<vmem>>, %arg6: memref<8x1xf32, #tpu.memory_space<vmem>>, %arg7: memref<4x8xf32, #tpu.memory_space<vmem>>, %arg8: memref<4x1xf32, #tpu.memory_space<vmem>>, %arg9: memref<1x4x256xf32, #tpu.memory_space<vmem>>) attributes {dimension_semantics = [#tpu.dimension_semantics<parallel>, #tpu.dimension_semantics<parallel>], iteration_bounds = array<i64: 2, 1>, scalar_prefetch = 0 : i64, scratch_operands = 0 : i64, tpu.core_type = #tpu.core_type<tc>, window_params = [{transform_indices = @transform_0, window_bounds = array<i64: 1, 8, 256>}, {pipeline_mode = #tpu.pipeline_mode<synchronous>, transform_indices = @transform_1, window_bounds = array<i64: 8, 8>}, {pipeline_mode = #tpu.pipeline_mode<synchronous>, transform_indices = @transform_2, window_bounds = array<i64: 8, 1>}, {pipeline_mode = #tpu.pipeline_mode<synchronous>, transform_indices = @transform_3, window_bounds = array<i64: 8, 8>}, {pipeline_mode = #tpu.pipeline_mode<synchronous>, transform_indices = @transform_4, window_bounds = array<i64: 8, 1>}, {pipeline_mode = #tpu.pipeline_mode<synchronous>, transform_indices = @transform_5, window_bounds = array<i64: 4, 8>}, {pipeline_mode = #tpu.pipeline_mode<synchronous>, transform_indices = @transform_6, window_bounds = array<i64: 4, 1>}, {transform_indices = @transform_7, window_bounds = array<i64: 1, 4, 256>}]} {
    %c0 = arith.constant 0 : index
    %c0_0 = arith.constant 0 : index
    %c0_1 = arith.constant 0 : index
    %0 = vector.load %arg2[%c0, %c0_0, %c0_1] : memref<1x8x256xf32, #tpu.memory_space<vmem>>, vector<1x8x256xf32>
    %1 = vector.shape_cast %0 : vector<1x8x256xf32> to vector<8x256xf32>
    %c0_2 = arith.constant 0 : index
    %c0_3 = arith.constant 0 : index
    %2 = vector.load %arg3[%c0_2, %c0_3] : memref<8x8xf32, #tpu.memory_space<vmem>>, vector<8x8xf32>
    %cst = arith.constant dense<0.000000e+00> : vector<8x256xf32>
    %3 = tpu.matmul %2, %1, %cst {dimension_numbers = #tpu.dot_dimension_numbers<[1], [0], [0], [1], [0, 0, 1, 1], [], []>} : vector<8x8xf32>, vector<8x256xf32>, vector<8x256xf32> -> vector<8x256xf32>
    %c0_4 = arith.constant 0 : index
    %c0_5 = arith.constant 0 : index
    %4 = vector.load %arg4[%c0_4, %c0_5] : memref<8x1xf32, #tpu.memory_space<vmem>>, vector<8x1xf32>
    %5 = vector.broadcast %4 : vector<8x1xf32> to vector<8x256xf32>
    %6 = arith.addf %3, %5 : vector<8x256xf32>
    %cst_6 = arith.constant 0.000000e+00 : f32
    %7 = vector.broadcast %cst_6 : f32 to vector<8x256xf32>
    %8 = arith.cmpf ogt, %6, %7 : vector<8x256xf32>
    %cst_7 = arith.constant 0.00999999977 : f32
    %9 = vector.broadcast %cst_7 : f32 to vector<8x256xf32>
    %10 = arith.mulf %9, %6 : vector<8x256xf32>
    %11 = arith.select %8, %6, %10 : vector<8x256xi1>, vector<8x256xf32>
    %c0_8 = arith.constant 0 : index
    %c0_9 = arith.constant 0 : index
    %12 = vector.load %arg5[%c0_8, %c0_9] : memref<8x8xf32, #tpu.memory_space<vmem>>, vector<8x8xf32>
    %cst_10 = arith.constant dense<0.000000e+00> : vector<8x256xf32>
    %13 = tpu.matmul %12, %11, %cst_10 {dimension_numbers = #tpu.dot_dimension_numbers<[1], [0], [0], [1], [0, 0, 1, 1], [], []>} : vector<8x8xf32>, vector<8x256xf32>, vector<8x256xf32> -> vector<8x256xf32>
    %c0_11 = arith.constant 0 : index
    %c0_12 = arith.constant 0 : index
    %14 = vector.load %arg6[%c0_11, %c0_12] : memref<8x1xf32, #tpu.memory_space<vmem>>, vector<8x1xf32>
    %15 = vector.broadcast %14 : vector<8x1xf32> to vector<8x256xf32>
    %16 = arith.addf %13, %15 : vector<8x256xf32>
    %cst_13 = arith.constant 0.000000e+00 : f32
    %17 = vector.broadcast %cst_13 : f32 to vector<8x256xf32>
    %18 = arith.cmpf ogt, %16, %17 : vector<8x256xf32>
    %cst_14 = arith.constant 0.00999999977 : f32
    %19 = vector.broadcast %cst_14 : f32 to vector<8x256xf32>
    %20 = arith.mulf %19, %16 : vector<8x256xf32>
    %21 = arith.select %18, %16, %20 : vector<8x256xi1>, vector<8x256xf32>
    %c0_15 = arith.constant 0 : index
    %c0_16 = arith.constant 0 : index
    %22 = vector.load %arg7[%c0_15, %c0_16] : memref<4x8xf32, #tpu.memory_space<vmem>>, vector<4x8xf32>
    %cst_17 = arith.constant dense<0.000000e+00> : vector<4x256xf32>
    %23 = tpu.matmul %22, %21, %cst_17 {dimension_numbers = #tpu.dot_dimension_numbers<[1], [0], [0], [1], [0, 0, 1, 1], [], []>} : vector<4x8xf32>, vector<8x256xf32>, vector<4x256xf32> -> vector<4x256xf32>
    %c0_18 = arith.constant 0 : index
    %c0_19 = arith.constant 0 : index
    %24 = vector.load %arg8[%c0_18, %c0_19] : memref<4x1xf32, #tpu.memory_space<vmem>>, vector<4x1xf32>
    %25 = vector.broadcast %24 : vector<4x1xf32> to vector<4x256xf32>
    %26 = arith.addf %23, %25 : vector<4x256xf32>
    %c0_20 = arith.constant 0 : index
    %c0_21 = arith.constant 0 : index
    %c0_22 = arith.constant 0 : index
    %27 = vector.load %arg9[%c0_20, %c0_21, %c0_22] : memref<1x4x256xf32, #tpu.memory_space<vmem>>, vector<1x4x256xf32>
    %28 = vector.shape_cast %27 : vector<1x4x256xf32> to vector<4x256xf32>
    %29 = vector.shape_cast %26 : vector<4x256xf32> to vector<1x4x256xf32>
    tpu.vector_store %arg9[%c0_20, %c0_21, %c0_22], %29 {strides = array<i32>} : memref<1x4x256xf32, #tpu.memory_space<vmem>>, vector<1x4x256xf32>,
    return
  }
  func.func @transform_0(%arg0: i32, %arg1: i32) -> (i32, i32, i32) {
    %c0_i32 = arith.constant 0 : i32
    %c0_i32_0 = arith.constant 0 : i32
    return %arg0, %c0_i32, %arg1 : i32, i32, i32
  }
  func.func @transform_1(%arg0: i32, %arg1: i32) -> (i32, i32) {
    %c0_i32 = arith.constant 0 : i32
    %c0_i32_0 = arith.constant 0 : i32
    %c0_i32_1 = arith.constant 0 : i32
    return %c0_i32, %c0_i32_0 : i32, i32
  }
  func.func @transform_2(%arg0: i32, %arg1: i32) -> (i32, i32) {
    %c0_i32 = arith.constant 0 : i32
    %c0_i32_0 = arith.constant 0 : i32
    %c0_i32_1 = arith.constant 0 : i32
    return %c0_i32, %c0_i32_0 : i32, i32
  }
  func.func @transform_3(%arg0: i32, %arg1: i32) -> (i32, i32) {
    %c0_i32 = arith.constant 0 : i32
    %c0_i32_0 = arith.constant 0 : i32
    %c0_i32_1 = arith.constant 0 : i32
    return %c0_i32, %c0_i32_0 : i32, i32
  }
  func.func @transform_4(%arg0: i32, %arg1: i32) -> (i32, i32) {
    %c0_i32 = arith.constant 0 : i32
    %c0_i32_0 = arith.constant 0 : i32
    %c0_i32_1 = arith.constant 0 : i32
    return %c0_i32, %c0_i32_0 : i32, i32
  }
  func.func @transform_5(%arg0: i32, %arg1: i32) -> (i32, i32) {
    %c0_i32 = arith.constant 0 : i32
    %c0_i32_0 = arith.constant 0 : i32
    %c0_i32_1 = arith.constant 0 : i32
    return %c0_i32, %c0_i32_0 : i32, i32
  }
  func.func @transform_6(%arg0: i32, %arg1: i32) -> (i32, i32) {
    %c0_i32 = arith.constant 0 : i32
    %c0_i32_0 = arith.constant 0 : i32
    %c0_i32_1 = arith.constant 0 : i32
    return %c0_i32, %c0_i32_0 : i32, i32
  }
  func.func @transform_7(%arg0: i32, %arg1: i32) -> (i32, i32, i32) {
    %c0_i32 = arith.constant 0 : i32
    %c0_i32_0 = arith.constant 0 : i32
    return %arg0, %c0_i32, %arg1 : i32, i32, i32
  }
}

</mosaic_0001>

<bundles_post_ra>
// kernel: ts_deep_fc_decoder.1
= control target key start
LH: loop header
LB: loop body
LE: loop exit
PB: predicated region body
PF: predicated region fallthrough
CT: control target
= control target key end

     0   :  { %12 = vsyncpa [#allocation3], 0  ;;  %s997_s0 = inlined_call_operand.vmem [shape: f32[2,8,256], index: 0, kind: input, shape index: {}]   ;;  %s998_s1 = inlined_call_operand.vmem [shape: f32[8,8], index: 1, kind: input, shape index: {}]   ;;  %s999_s2 = inlined_call_operand.vmem [shape: f32[8,1], index: 2, kind: input, shape index: {}]   ;;  %s1000_s3 = inlined_call_operand.vmem [shape: f32[8,8], index: 3, kind: input, shape index: {}]   ;;  %s1001_s4 = inlined_call_operand.vmem [shape: f32[8,1], index: 4, kind: input, shape index: {}]   ;;  %s1002_s5 = inlined_call_operand.vmem [shape: f32[4,8], index: 5, kind: input, shape index: {}]   ;;  %s1003_s6 = inlined_call_operand.vmem [shape: f32[4,1], index: 6, kind: input, shape index: {}]   ;;  %s1004_s7 = inlined_call_operand.hbm [shape: f32[2,4,256], index: 7, kind: output, shape index: {}]  }
   0x1   :  { %14 = vsyncpa [#allocation3 + $0x1], 0  ;;  %s864_s24 = smov 0   ;;  %s866_s25 = smov 0  }
   0x2   :  { %s868_s26 = smov 0   ;;  %s870_s27 = smov 0  }
   0x3   :  { %s872_s28 = smov 0   ;;  %s874_s29 = smov 0  }
   0x4 LB: > { %s664_s30 = sadd.s32 4294967295, %s819_s29   ;;  %s665_s8 = sadd.s32 4294967294, %s819_s29   ;;  %s819_s29 = sphi %s874_s29, %s20_s29   ;;  %s815_s28 = sphi %s872_s28, %s1011_s28   ;;  %s811_s27 = sphi %s870_s27, %s1010_s27   ;;  %s807_s26 = sphi %s868_s26, %s1009_s26   ;;  %s803_s25 = sphi %s866_s25, %s1008_s25   ;;  %s799_s24 = sphi %s864_s24, %s1007_s24  }
   0x5   : > { %s32_s9 = sadd.s32 1, %s815_s28  ;;  %s195_s10 = sadd.s32 1, %s807_s26 }
   0x6   : > { %p34_p0 = scmp.ge.s32.totalorder %s32_s9, 2  ;;  %p205_p1 = scmp.ne.s32.totalorder %s807_s26, %s803_s25 }
   0x7   : > { %p206_p2 = scmp.eq.s32.totalorder %s664_s30, 1  ;;  %p211_p3 = scmp.ne.s32.totalorder %s803_s25, %s799_s24 }
   0x8   : > { %s1013_s9 = smov (%p34_p0, %s32_s9), 0  ;;  %p212_p5 = scmp.eq.s32.totalorder %s665_s8, 1 }
   0x9   : > { %p904_p4 = por %p206_p2, %p205_p1  ;;  %s190_s12 = ssub.s32 %s815_s28, %s1013_s9 }
   0xa   : > { %p668_p6 = scmp.ge.s32.totalorder %s819_s29, 1  ;;  %p193_p7 = scmp.eq.s32.totalorder %s190_s12, 0 }
   0xb   : > { %p911_p8 = por %p212_p5, %p211_p3  ;;  %p261_p9 = scmp.lt.s32.totalorder %s819_s29, 3 }
   0xc   : > { %s917_s14 = scalar_select %p193_p7, %s807_s26, %s195_s10  }
   0xd   : > { %p262_p10 = pnand %p668_p6, %p261_p9 }
   0xe   : > { %p298_p11 = scmp.lt.s32.totalorder (!%p262_p10), %s811_s27, 1  ;;  %v311_v0 = vld [vmem:[%s999_s2] sm:$0xff] (!%p262_p10)  ;;  %v821_v1 = vmov (!%p262_p10), 0.0   ;;  %v822_v2 = vmov (!%p262_p10), 0   ;;  %vm317_vm0 = vcmask (!%p262_p10), 64512   ;;  %s294_s19 = sand.u32 (!%p262_p10), 1, %s803_s25  }
   0xf   : > { %265 = sbr.rel (%p262_p10) target bundleno = 700 (0x2bc), region = 48  ;;  %385 = vmatprep.mubr.f32.mxu0 (!%p262_p10), %v821_v1  ;;  %739 = vset.pattern.permute.xlu0 (!%p262_p10), %v822_v2  ;;  %v399_v3 = vld [vmem:[%s1001_s4] sm:$0xff] (!%p262_p10)  ;;  %s681_s21 = sshll.u32 (!%p262_p10), %s811_s27, 7 }
  0x10   : > { %314 = vperm.xlu0 (!%p262_p10), %739, %v311_v0   ;;  %472 = vmatprep.mubr.f32.mxu1 (!%p262_p10), %v821_v1  ;;  %v310_v6 = vld [vmem:[%s998_s1] sm:$0xff] (!%p262_p10)  ;;  %s950_s10 = scalar_lea.hbm (!%p262_p10), %s1004_s7, %s681_s21  ;;  %s572_s12 = scalar_lea.sflag (!%p262_p10), [#allocation3], %s294_s19 }
  0x11   : > { %740 = vset.pattern.permute.xlu1 (!%p262_p10), %v822_v2  ;;  %v398_v15 = vld [vmem:[%s1000_s3] sm:$0xff] (!%p262_p10) }
  0x12   : > { %v486_v17 = vld [vmem:[%s1003_s6] sm:$0xf] (!%p262_p10) }
  0x13   : > { %489 = vperm.xlu1 (!%p262_p10), %740, %v486_v17   ;;  %v485_v26 = vld [vmem:[%s1002_s5] sm:$0xf] (!%p262_p10) }
  0x14   : > { %402 = vperm.xlu0 (!%p262_p10), %739, %v399_v3  }
  0x16   : > { %s299_s17 = scalar_select %p298_p11, %s811_s27, 1 }
  0x17   : > { %s823_s27 = smov [#allocation2]  }
  0x18   : > { %s680_s20 = sshll.u32 %s299_s17, 4  ;;  %s745_s16 = sshll.u32 %s823_s27, 4  ;;  %s746_s16 = int_to_ptr.vmem [resolvable:$false] %s745_s16 }
  0x19   : > { %s305_s23 = scalar_lea.vmem %s997_s0, %s680_s20  ;;  %s669_s20 = sshll.u32 %s294_s19, 3 }
  0x1a   : > { %v309_v4 = vld [vmem:[%s305_s23 + $0x8] sm:$0xff]  ;;  %v308_v5 = vld [vmem:[%s305_s23] sm:$0xff]  ;;  %s296_s22 = scalar_lea.vmem [#allocation2], %s669_s20  ;;  %s747_s17 = scalar_lea.vmem %s746_s16, 256 }
  0x1b   : > { %321 = vmatprep.subr.mxu0 %v309_v4  ;;  %s588_s23 = sshll.u32 %s296_s22, 4  ;;  %s952_s23 = int_to_ptr.vmem [resolvable:$true] %s588_s23 }
  0x1c   : > { %322 = vmatpush1.msra.mxu0 %v308_v5  ;;  %s741_s15 = scalar_lea.vmem %s952_s23, 128  ;;  %p748_p1 = scmp.lt.s32.totalorder %s952_s23, %s746_s16 }
  0x1d   : > { %672 = vmatmul.mubr.msk.f32.vlgmr.msra.gmra.mrb[0].mxu0 %vm317_vm0, %v310_v6  ;;  %p742_p12 = scmp.ne.s32.totalorder %s952_s23, %s741_s15  ;;  %p749_p2 = scmp.lt.s32.totalorder %s747_s17, %s741_s15 }
  0x1e   : > { %559 = vmatprep.mubr.f32.mxu0 %v821_v1 }
  0x1f   : > { %p743_p13 = pnand %p742_p12, %p904_p4  ;;  %p750_p3 = por %p749_p2, %p748_p1 }
  0x21   : > { %p744_p0 = pneg %p743_p13 }
  0x23   : > { %p751_p5 = pnand %p750_p3, %p744_p0 }
  0x8f   : > { %v315_v7 = vpop.permute.xlu0 %314 }
  0x92   : > { %v490_v28 = vpop.permute.xlu1 %489 }
  0x93   : > { %v403_v18 = vpop.permute.xlu0 %402 }
  0xf0   : > { %v387_v8 = vpop.f32.mrb[0].mxu0 }
  0xf1   : > { %v388_v9 = vadd.f32 %v387_v8, %v315_v7  ;;  %v389_v10 = vpop.f32.mrb[1].mxu0 }
  0xf2   : > { %v390_v11 = vadd.f32 %v389_v10, %v315_v7 }
  0xf3   : > { %v394_v12 = vmul.f32 0.01, %v388_v9  ;;  %vm392_vm2 = vcmp.gt.f32.partialorder %v388_v9, 0.0 }
  0xf4   : > { %vm393_vm1 = vcmp.gt.f32.partialorder %v390_v11, 0.0  ;;  %v395_v13 = vmul.f32 0.01, %v390_v11 }
  0xf5   : > { %v396_v16 = vsel %vm392_vm2, %v388_v9, %v394_v12 }
  0xf6   : > { %v397_v14 = vsel %vm393_vm1, %v390_v11, %v395_v13 }
  0xf7   : > { %408 = vmatprep.subr.mxu1 %v397_v14 }
  0xf8   : > { %409 = vmatpush1.msra.mxu1 %v396_v16 }
  0xf9   : > { %673 = vmatmul.mubr.msk.f32.vlgmr.msra.gmra.mrb[0].mxu1 %vm317_vm0, %v398_v15 }
 0x1cc   : > { %v474_v19 = vpop.f32.mrb[0].mxu1 }
 0x1cd   : > { %v475_v20 = vadd.f32 %v474_v19, %v403_v18  ;;  %v476_v21 = vpop.f32.mrb[1].mxu1 }
 0x1ce   : > { %v477_v22 = vadd.f32 %v476_v21, %v403_v18 }
 0x1cf   : > { %v481_v23 = vmul.f32 0.01, %v475_v20  ;;  %vm479_vm3 = vcmp.gt.f32.partialorder %v475_v20, 0.0 }
 0x1d0   : > { %v482_v24 = vmul.f32 0.01, %v477_v22  ;;  %vm480_vm4 = vcmp.gt.f32.partialorder %v477_v22, 0.0 }
 0x1d1   : > { %v483_v27 = vsel %vm479_vm3, %v475_v20, %v481_v23 }
 0x1d2   : > { %v484_v25 = vsel %vm480_vm4, %v477_v22, %v482_v24 }
 0x1d3   : > { %495 = vmatprep.subr.mxu0 %v484_v25 }
 0x1d4   : > { %496 = vmatpush1.msra.mxu0 %v483_v27 }
 0x1d5   : > { %674 = vmatmul.mubr.msk.f32.vlgmr.msra.gmra.mrb[2].mxu0 %vm317_vm0, %v485_v26 }
 0x2a8   : > { %v561_v29 = vpop.f32.mrb[2].mxu0 }
 0x2a9   : > { %v562_v30 = vadd.f32 %v561_v29, %v490_v28  ;;  %v563_v31 = vpop.f32.mrb[3].mxu0 }
 0x2aa   : > { %v564_v32 = vadd.f32 %v563_v31, %v490_v28 }
 0x2ac   : > { %v568_v33 = vcombine.low %v562_v30, %v564_v32 }
 0x2ae   : > { %570 = vst [vmem:[%s296_s22] sm:$0xff] %v568_v33 }
 0x2af   : > { %754 = shalt.err (!%p751_p5)
}
 0x2b0   : > { %s755_s18 = scalar_lea.hbm %s950_s10, 128  ;;  %s759_s21 = scalar_lea.hbm %s1004_s7, 256 }
 0x2b1   : > { %p756_p6 = scmp.ne.s32.totalorder %s950_s10, %s755_s18  ;;  %p760_p10 = scmp.lt.u32.totalorder %s950_s10, %s1004_s7 }
 0x2b2   : > { %p761_p11 = scmp.lt.u32.totalorder %s759_s21, %s755_s18  ;;  %p763_p13 = scmp.lt.u32.totalorder %s755_s18, %s950_s10 }
 0x2b3   : > { %p757_p7 = pnand %p756_p6, %p904_p4 }
 0x2b4   : > { %p762_p12 = por %p761_p11, %p760_p10 }
 0x2b5   : > { %p758_p9 = pneg %p757_p7 }
 0x2b6   : > { %p764_p0 = por %p763_p13, %p762_p12 }
 0x2b8   : > { %p765_p1 = pnand %p764_p0, %p758_p9 }
 0x2ba   : > { %768 = shalt.err (!%p765_p1)
}
 0x2bb   : > { %682 = dma.vmem_to_hbm [thread:$0]  (%p904_p4), %s952_s23, 128, %s950_s10, %s572_s12  }
 0x2bc PF: > { %p688_p2 = scmp.ge.s32.totalorder %s819_s29, 2  ;;  %s600_s8 = sand.u32 1, %s799_s24  }
 0x2bd   : > { %s601_s15 = scalar_lea.sflag [#allocation3], %s600_s8 }
 0x2be   : > { %p685_p3 = pnand %p688_p2, %p911_p8 }
 0x2c0   : > { %794 = dma.done.wait (!%p685_p3), %s601_s15, 128  }
 0x2c1   : > { %796 = vsyncadd (!%p685_p3), %s601_s15, 4294967168  ;;  %s20_s29 = sadd.s32 1, %s819_s29   ;;  %s1007_s24 = smov %s803_s25 }
 0x2c2   : > { %p17_p5 = scmp.ge.s32.totalorder %s20_s29, 4   ;;  %s1008_s25 = smov %s807_s26 }
 0x2c3   : > { %s1009_s26 = smov %s917_s14  ;;  %s1010_s27 = smov %s815_s28 }
 0x2c4   : > { %s1011_s28 = smov %s1013_s9  ;;  %19 = sbr.rel (!%p17_p5) target bundleno = 4 (0x4), region = 83 }
 0x2cb   :  { %606 = vsyncpa [#allocation3], 1 }
 0x2cc   :  { %608 = vsyncpa [#allocation3 + $0x1], 1 }

</bundles_post_ra>
